<compile_context>
chip_gen: v7x
topology: tpu7x:2x2x1
jax: 0.10.0
libtpu: 0.0.40
codegen_flags: <defaults>
</compile_context>

<pallas_src>
import functools

import jax
import jax.numpy as jnp
from jax.experimental import pallas as pl
from jax.experimental.pallas import tpu as pltpu


_VMEM_STEP_TARGET = 20 * 1024 * 1024   # per-grid-step working-set budget
_VMEM_LIMIT_BYTES = 32 * 1024 * 1024   # requested scoped-VMEM limit (ok on v5e/v6e/v7x)
_MAX_TILE_B = 32768                    # sanity cap; byte budget usually binds first
_STREAM_C_THRESHOLD = 16384            # above this, stream over the class axis
_STREAM_TILE_C = 2048                  # class-block width when streaming


def _round_down(x, m):
    return (x // m) * m


# ---------------------------------------------------------------------------
# Kernels
# ---------------------------------------------------------------------------
def _ce_loss_kernel(pred_ref, target_ref, loss_ref, *, smoothing_eps):
    """Per-sample CE for one (TILE_B, C) tile; full class axis resident."""
    pred = pred_ref[...].astype(jnp.float32)        # (TB, C) cast on load
    tgt = target_ref[...]                           # (TB, 1) int32
    tb, num_classes = pred.shape

    m = jnp.max(pred, axis=1, keepdims=True)                       # (TB, 1)
    lse = m + jnp.log(jnp.sum(jnp.exp(pred - m), axis=1, keepdims=True))

    col = jax.lax.broadcasted_iota(jnp.int32, (tb, num_classes), 1)
    p_t = jnp.sum(jnp.where(col == tgt, pred, 0.0), axis=1, keepdims=True)

    if smoothing_eps > 0.0:
        s = jnp.sum(pred, axis=1, keepdims=True)
        loss = lse - (1.0 - smoothing_eps) * p_t - (smoothing_eps / num_classes) * s
    else:
        loss = lse - p_t
    loss_ref[...] = loss                                           # (TB, 1)


def _ce_loss_stream_kernel(pred_ref, target_ref, loss_ref,
                           m_sc, l_sc, t_sc, s_sc,
                           *, smoothing_eps, num_classes, tile_c):
    """Streaming (online-LSE) CE: grid = (batch tiles, class blocks)."""
    j = pl.program_id(1)

    @pl.when(j == 0)
    def _():
        m_sc[...] = jnp.full_like(m_sc, -jnp.inf)
        l_sc[...] = jnp.zeros_like(l_sc)
        t_sc[...] = jnp.zeros_like(t_sc)
        s_sc[...] = jnp.zeros_like(s_sc)

    pred = pred_ref[...].astype(jnp.float32)        # (TB, TC)
    tgt = target_ref[...]                           # (TB, 1) int32
    tb, tc = pred.shape

    col = jax.lax.broadcasted_iota(jnp.int32, (tb, tc), 1) + j * tile_c
    valid = col < num_classes                       # mask ragged class tail
    pred = jnp.where(valid, pred, -jnp.inf)

    m_old = m_sc[...]
    m_new = jnp.maximum(m_old, jnp.max(pred, axis=1, keepdims=True))
    alpha = jnp.exp(m_old - m_new)
    l_sc[...] = alpha * l_sc[...] + jnp.sum(jnp.exp(pred - m_new),
                                            axis=1, keepdims=True)
    m_sc[...] = m_new
    # raw pred at the target class (hits exactly one class block per row)
    t_sc[...] += jnp.sum(jnp.where(col == tgt, pred, 0.0), axis=1, keepdims=True)
    if smoothing_eps > 0.0:
        s_sc[...] += jnp.sum(jnp.where(valid, pred, 0.0), axis=1, keepdims=True)

    @pl.when(j == pl.num_programs(1) - 1)
    def _():
        lse = m_sc[...] + jnp.log(l_sc[...])
        if smoothing_eps > 0.0:
            loss = (lse - (1.0 - smoothing_eps) * t_sc[...]
                    - (smoothing_eps / num_classes) * s_sc[...])
        else:
            loss = lse - t_sc[...]
        loss_ref[...] = loss


# ---------------------------------------------------------------------------
# Wrapper
# ---------------------------------------------------------------------------
def _choose_tile_b(b_rows, c_block, itemsize, sublane, requested=None):
    if requested is not None:
        rows = max(sublane, _round_down(int(requested), sublane))
    else:
        # per-row per-step bytes: 2x double-buffered input + ~4 f32 temporaries
        per_row = c_block * (2 * itemsize + 16) + 32
        rows = _VMEM_STEP_TARGET // max(1, per_row)
        rows = min(rows, _MAX_TILE_B)
        rows = max(sublane, _round_down(rows, sublane))
        # keep >= 2 grid steps when possible so both v7x TensorCores get work
        if b_rows >= 2 * sublane:
            rows = min(rows, max(sublane, _round_down(b_rows // 2, sublane)))
    # never let the block exceed the batch extent (ragged tails are fine)
    rows = min(rows, max(sublane, _round_down(b_rows, sublane)))
    return rows


def ohem_loss(pred, target, *, rate=0.7, smoothing_eps=0.0,
              tile_b=None, tile_c=None):
    """pred: (B, C) float (any float dtype), target: (B,) int.

    Returns the scalar OHEM loss (float32), matching OHEMLoss.forward
    (loss=None branch).
    """
    B, C = pred.shape
    itemsize = jnp.dtype(pred.dtype).itemsize
    sublane = max(8, 32 // max(1, itemsize))   # packed sublane multiple

    target2d = target.reshape(B, 1).astype(jnp.int32)

    # Only pad the tiny-batch corner case; large ragged batches go unpadded.
    b_rows = B
    if B < sublane:
        pad = sublane - B
        pred = jnp.pad(pred, ((0, pad), (0, 0)))
        target2d = jnp.pad(target2d, ((0, pad), (0, 0)))
        b_rows = sublane

    if tile_c is None:
        tile_c = C if C <= _STREAM_C_THRESHOLD else min(_STREAM_TILE_C, C)
    tile_c = int(min(tile_c, C))
    if tile_c < C and tile_c % 128 != 0:
        raise ValueError("tile_c must be a multiple of 128 when streaming over classes")

    tb = _choose_tile_b(b_rows, tile_c, itemsize, sublane, requested=tile_b)
    nb = pl.cdiv(b_rows, tb)

    if tile_c >= C:
        losses = pl.pallas_call(
            functools.partial(_ce_loss_kernel,
                              smoothing_eps=float(smoothing_eps)),
            out_shape=jax.ShapeDtypeStruct((b_rows, 1), jnp.float32),
            grid=(nb,),
            in_specs=[
                pl.BlockSpec((tb, C), lambda i: (i, 0)),   # pred tile
                pl.BlockSpec((tb, 1), lambda i: (i, 0)),   # target tile
            ],
            out_specs=pl.BlockSpec((tb, 1), lambda i: (i, 0)),
            compiler_params=pltpu.CompilerParams(
                dimension_semantics=("parallel",),
                vmem_limit_bytes=_VMEM_LIMIT_BYTES),
        )(pred, target2d)
    else:
        nc = pl.cdiv(C, tile_c)
        losses = pl.pallas_call(
            functools.partial(_ce_loss_stream_kernel,
                              smoothing_eps=float(smoothing_eps),
                              num_classes=C, tile_c=tile_c),
            out_shape=jax.ShapeDtypeStruct((b_rows, 1), jnp.float32),
            grid=(nb, nc),
            in_specs=[
                pl.BlockSpec((tb, tile_c), lambda i, j: (i, j)),
                pl.BlockSpec((tb, 1), lambda i, j: (i, 0)),
            ],
            out_specs=pl.BlockSpec((tb, 1), lambda i, j: (i, 0)),
            scratch_shapes=[pltpu.VMEM((tb, 1), jnp.float32)] * 4,
            compiler_params=pltpu.CompilerParams(
                dimension_semantics=("parallel", "arbitrary"),
                vmem_limit_bytes=_VMEM_LIMIT_BYTES),
        )(pred, target2d)

    loss_vec = losses.reshape(-1)[:B]

    # --- Stage 2: hard-example selection over B scalars (plain JAX). ---
    keep_num = max(1, min(B, int(B * rate)))       # guarded divergence (see header)
    drop_num = B - keep_num
    total = jnp.sum(loss_vec)
    if drop_num == 0:
        kept_sum = total
    elif keep_num <= drop_num:
        kept_sum = jnp.sum(jax.lax.top_k(loss_vec, keep_num)[0])
    else:
        # usual OHEM regime (rate ~ 0.7): find the few SMALLEST losses instead
        # of running top_k with k ~ 0.7*B, then subtract from the total.
        kept_sum = total + jnp.sum(jax.lax.top_k(-loss_vec, drop_num)[0])
    return kept_sum / keep_num


# ---------------------------------------------------------------------------
# Pure-JAX reference (mirrors the PyTorch forward, loss=None branch)
# ---------------------------------------------------------------------------
def _reference(pred, target, *, rate=0.7, smoothing_eps=0.0):
    B, C = pred.shape
    logp = jax.nn.log_softmax(pred.astype(jnp.float32), axis=1)
    onehot = jax.nn.one_hot(target, C, dtype=jnp.float32)
    if smoothing_eps > 0:
        soft = onehot * (1 - smoothing_eps) + smoothing_eps / C
    else:
        soft = onehot
    loss = jnp.sum(-logp * soft, axis=1)
    keep_num = min(B, int(B * rate))
    sorted_loss = jnp.sort(loss)[::-1]
    return jnp.sum(sorted_loss[:keep_num]) / keep_num


if __name__ == "__main__":
    key = jax.random.PRNGKey(0)
    ks = jax.random.split(key, 8)

    # 1) f32, no smoothing, default tiling (>=2 grid steps via megacore clamp).
    B, C = 16, 32
    pred = jax.random.normal(ks[0], (B, C), dtype=jnp.float32)
    target = jax.random.randint(ks[1], (B,), 0, C, dtype=jnp.int32)
    out = jax.block_until_ready(ohem_loss(pred, target, rate=0.7))
    ref = _reference(pred, target, rate=0.7)
    assert jnp.allclose(out, ref, rtol=1e-5, atol=1e-5), (out, ref)

    # 2) ragged batch (72 = 4*16 + 8 tail rows, NO pad copy), bf16 on the wire,
    #    label smoothing, forced small tile_b -> 5 grid steps.
    B2, C2 = 72, 32
    pred2 = jax.random.normal(ks[2], (B2, C2), dtype=jnp.float32).astype(jnp.bfloat16)
    target2 = jax.random.randint(ks[3], (B2,), 0, C2, dtype=jnp.int32)
    out2 = jax.block_until_ready(
        ohem_loss(pred2, target2, rate=0.7, smoothing_eps=0.1, tile_b=16))
    ref2 = _reference(pred2, target2, rate=0.7, smoothing_eps=0.1)
    assert jnp.allclose(out2, ref2, rtol=1e-5, atol=1e-5), (out2, ref2)

    # 3) streaming-over-classes path (2-D grid, online LSE) with a ragged,
    #    masked class tail: C=160 streamed in tile_c=128 blocks.
    B3, C3 = 24, 160
    pred3 = jax.random.normal(ks[4], (B3, C3), dtype=jnp.float32)
    target3 = jax.random.randint(ks[5], (B3,), 0, C3, dtype=jnp.int32)
    out3 = jax.block_until_ready(
        ohem_loss(pred3, target3, rate=0.7, smoothing_eps=0.1, tile_c=128))
    ref3 = _reference(pred3, target3, rate=0.7, smoothing_eps=0.1)
    assert jnp.allclose(out3, ref3, rtol=1e-5, atol=1e-5), (out3, ref3)

    # 4) tiny batch (< one packed sublane) exercises the only remaining pad path.
    B4, C4 = 4, 32
    pred4 = jax.random.normal(ks[6], (B4, C4), dtype=jnp.float32)
    target4 = jax.random.randint(ks[7], (B4,), 0, C4, dtype=jnp.int32)
    out4 = jax.block_until_ready(ohem_loss(pred4, target4, rate=0.7))
    ref4 = _reference(pred4, target4, rate=0.7)
    assert jnp.allclose(out4, ref4, rtol=1e-5, atol=1e-5), (out4, ref4)

    print("KERNEL_OK")
</pallas_src>

<mosaic_0001>
module attributes {stable_mosaic.version = 11 : i64} {
  func.func @_ce_loss_kernel(%arg0: i32, %arg1: memref<8x32xf32, #tpu.memory_space<vmem>>, %arg2: memref<8x1xi32, #tpu.memory_space<vmem>>, %arg3: memref<8x1xf32, #tpu.memory_space<vmem>>) attributes {dimension_semantics = [#tpu.dimension_semantics<parallel>], iteration_bounds = array<i64: 2>, scalar_prefetch = 0 : i64, scratch_operands = 0 : i64, tpu.core_type = #tpu.core_type<tc>, window_params = [{transform_indices = @transform_0, window_bounds = array<i64: 8, 32>}, {transform_indices = @transform_1, window_bounds = array<i64: 8, 1>}, {transform_indices = @transform_2, window_bounds = array<i64: 8, 1>}]} {
    %c0 = arith.constant 0 : index
    %c0_0 = arith.constant 0 : index
    %0 = vector.load %arg1[%c0, %c0_0] : memref<8x32xf32, #tpu.memory_space<vmem>>, vector<8x32xf32>
    %c0_1 = arith.constant 0 : index
    %c0_2 = arith.constant 0 : index
    %1 = vector.load %arg2[%c0_1, %c0_2] : memref<8x1xi32, #tpu.memory_space<vmem>>, vector<8x1xi32>
    %cst = arith.constant dense<0xFF800000> : vector<8xf32>
    %2 = vector.multi_reduction <maximumf>, %0, %cst [1] : vector<8x32xf32> to vector<8xf32>
    %3 = vector.shape_cast %2 : vector<8xf32> to vector<8x1xf32>
    %4 = vector.broadcast %3 : vector<8x1xf32> to vector<8x32xf32>
    %5 = arith.subf %0, %4 : vector<8x32xf32>
    %6 = math.exp %5 : vector<8x32xf32>
    %cst_3 = arith.constant dense<0.000000e+00> : vector<8xf32>
    %7 = vector.multi_reduction <add>, %6, %cst_3 [1] : vector<8x32xf32> to vector<8xf32>
    %8 = vector.shape_cast %7 : vector<8xf32> to vector<8x1xf32>
    %9 = math.log %8 : vector<8x1xf32>
    %10 = arith.addf %3, %9 : vector<8x1xf32>
    %11 = tpu.iota {dimensions = array<i32: 1>} : vector<8x32xi32>
    %12 = vector.broadcast %1 : vector<8x1xi32> to vector<8x32xi32>
    %13 = arith.cmpi eq, %11, %12 : vector<8x32xi32>
    %cst_4 = arith.constant 0.000000e+00 : f32
    %14 = vector.broadcast %cst_4 : f32 to vector<8x32xf32>
    %15 = arith.select %13, %0, %14 : vector<8x32xi1>, vector<8x32xf32>
    %cst_5 = arith.constant dense<0.000000e+00> : vector<8xf32>
    %16 = vector.multi_reduction <add>, %15, %cst_5 [1] : vector<8x32xf32> to vector<8xf32>
    %17 = vector.shape_cast %16 : vector<8xf32> to vector<8x1xf32>
    %18 = arith.subf %10, %17 : vector<8x1xf32>
    %c0_6 = arith.constant 0 : index
    %c0_7 = arith.constant 0 : index
    %19 = vector.load %arg3[%c0_6, %c0_7] : memref<8x1xf32, #tpu.memory_space<vmem>>, vector<8x1xf32>
    tpu.vector_store %arg3[%c0_6, %c0_7], %18 {strides = array<i32>} : memref<8x1xf32, #tpu.memory_space<vmem>>, vector<8x1xf32>,
    return
  }
  func.func @transform_0(%arg0: i32) -> (i32, i32) {
    %c0_i32 = arith.constant 0 : i32
    %c0_i32_0 = arith.constant 0 : i32
    return %arg0, %c0_i32 : i32, i32
  }
  func.func @transform_1(%arg0: i32) -> (i32, i32) {
    %c0_i32 = arith.constant 0 : i32
    %c0_i32_0 = arith.constant 0 : i32
    return %arg0, %c0_i32 : i32, i32
  }
  func.func @transform_2(%arg0: i32) -> (i32, i32) {
    %c0_i32 = arith.constant 0 : i32
    %c0_i32_0 = arith.constant 0 : i32
    return %arg0, %c0_i32 : i32, i32
  }
}

</mosaic_0001>

<bundles_post_ra>
// kernel: tpu_custom_call.1
= control target key start
LH: loop header
LB: loop body
LE: loop exit
PB: predicated region body
PF: predicated region fallthrough
CT: control target
= control target key end

     0   :  { %s297_s9 = smov 0   ;;  %s325_s0 = inlined_call_operand.vmem [shape: f32[16,32], index: 0, kind: input, shape index: {}]   ;;  %s326_s1 = inlined_call_operand.vmem [shape: s32[16,1], index: 1, kind: input, shape index: {}]   ;;  %s327_s2 = inlined_call_operand.vmem [shape: f32[16,1], index: 2, kind: output, shape index: {}]  }
   0x1 LB: > { %s249_s10 = sadd.s32 4294967295, %s279_s9   ;;  %p253_p0 = scmp.ge.s32.totalorder %s279_s9, 1  ;;  %s279_s9 = sphi %s297_s9, %s12_s9  }
   0x2   : > { %p120_p1 = scmp.lt.s32.totalorder %s279_s9, 3 }
   0x4   : > { %p121_p2 = pnand %p253_p0, %p120_p1 }
   0x5   : > { %p144_p3 = scmp.lt.s32.totalorder (!%p121_p2), %s249_s10, 1  ;;  %v281_v0 = vmov (!%p121_p2), 0   ;;  %vm158_vm0 = vcmask (!%p121_p2), 261120   ;;  %v171_v7 = vlaneseq (!%p121_p2)  ;;  %vm182_vm2 = vcmask (!%p121_p2), 7168  }
   0x6   : > { %124 = sbr.rel (%p121_p2) target bundleno = 336 (0x150), region = 28  ;;  %268 = vset.pattern.permute.xlu0 (!%p121_p2), %v281_v0 }
   0x7   : > { %v172_v8 = vand.u32 (!%p121_p2), 127, %v171_v7 }
   0xd   : > { %s329_s10 = smov (!%p144_p3, %s249_s10), 1 }
   0xe   : > { %s305_s11 = sshll.u32 %s329_s10, 3 }
   0xf   : > { %s147_s14 = scalar_lea.vmem %s325_s0, %s305_s11  ;;  %s151_s17 = scalar_lea.vmem %s326_s1, %s305_s11 }
  0x10   : > { %v156_v1 = vld [vmem:[%s147_s14] sm:$0xff]  ;;  %s155_s20 = scalar_lea.vmem %s327_s2, %s305_s11 }
  0x11   : > { %v159_v2 = vsel %vm158_vm0, %v156_v1, -inf  ;;  %v157_v3 = vld [vmem:[%s151_s17] sm:$0xff] }
  0x12   : > { %160 = vmax.xlane.f32.xlu0 %v159_v2 }
  0x28   : > { %174 = vperm.xlu0 %268, %v157_v3  }
  0x9f   : > { %v161_v4 = vpop.xlane.xlu0 %160 }
  0xa0   : > { %v162_v5 = vsub.f32 %v156_v1, %v161_v4 }
  0xa2   : > { %v163_v6 = vmul.f32 1.442695, %v162_v5 }
  0xa4   : > { %269 = vpow2.f32 %v163_v6 }
  0xa7   : > { %v175_v9 = vpop.permute.xlu0 %174 }
  0xa8   : > { %vm176_vm1 = vcmp.eq.s32.totalorder %v172_v8, %v175_v9 }
  0xa9   : > { %v177_v11 = vsel %vm176_vm1, %v156_v1, 0.0 }
  0xaa   : > { %v178_v13 = vsel %vm158_vm0, %v177_v11, 0.0 }
  0xae   : > { %v270_v10 = vpop.eup %269 }
  0xaf   : > { %v165_v12 = vsel %vm158_vm0, %v270_v10, 0.0 }
  0xb0   : > { %166 = vadd.xlane.f32.xlu1 %v165_v12 }
  0xb4   : > { %179 = vadd.xlane.f32.xlu1 %v178_v13 }
 0x13d   : > { %v167_v14 = vpop.xlane.xlu1 %166 }
 0x13e   : > { %271 = vlog2.f32 %v167_v14 }
 0x141   : > { %v180_v17 = vpop.xlane.xlu1 %179 }
 0x148   : > { %v272_v15 = vpop.eup %271 }
 0x149   : > { %v169_v16 = vmul.f32 0.6931472, %v272_v15 }
 0x14b   : > { %v170_v18 = vadd.f32 %v169_v16, %v161_v4 }
 0x14d   : > { %v181_v19 = vsub.f32 %v170_v18, %v180_v17 }
 0x14f   : > { %183 = vst.msk [vmem:[%s155_s20] sm:$0xff] %vm182_vm2, %v181_v19 }
 0x150 PF: > { %s12_s9 = sadd.s32 1, %s279_s9  }
 0x151   : > { %p9_p4 = scmp.ge.s32.totalorder %s12_s9, 4  }
 0x153   :  { %11 = sbr.rel (!%p9_p4) target bundleno = 1 (0x1), region = 61 }

</bundles_post_ra>
